<compile_context>
chip_gen: v7x
topology: tpu7x:2x2x1
jax: 0.10.0
libtpu: 0.0.40
codegen_flags: <defaults>
</compile_context>

<pallas_src>
import functools
import math

import jax
import jax.numpy as jnp
from jax.experimental import pallas as pl
from jax.experimental.pallas import tpu as pltpu

EPS = 1e-5
_DEFAULT_VMEM_BYTES = 64 * 1024 * 1024          # conservative fallback (v7x per-TC)
_SMALL_SINGLE_STRIPE_BYTES = 8 * 1024 * 1024    # below this, 1-stripe single-pass is fine


def _vmem_capacity_bytes() -> int:
    try:
        cap = int(pltpu.get_tpu_info().vmem_capacity_bytes)
        if cap > 0:
            return cap
    except Exception:
        pass
    return _DEFAULT_VMEM_BYTES


def _lane_tile_candidates(ep: int):
    """Stripe widths that divide ep and satisfy the (8,128) layout rule, descending."""
    if ep % 128 == 0:
        return [128 * k for k in range(ep // 128, 0, -1) if ep % (128 * k) == 0]
    return [ep]  # non-128-aligned feature dim must be taken as one full block


def _combine_lane_groups(v, pack: int, group: int):
    """v: (1, 128) per-lane partials of a lane-packed layout (lane l <-> feature l%group).
    Returns same shape where every lane holds the total over its feature's `pack` lane
    groups.  XLU lane rotations only."""
    if pack == 1:
        return v
    total = v
    for k in range(1, pack):
        total = total + pltpu.roll(v, shift=k * group, axis=1)
    return total


def _stripe_vmem_bytes(rows: int, te: int, itemsize: int, row_chunk: int) -> int:
    blocks = 4 * rows * te * itemsize                 # double-buffered in + out blocks
    chunk = min(row_chunk, rows)
    temps = 6 * chunk * te * 4                        # f32 chunk temporaries
    return blocks + temps + (256 << 10)


# --------------------------------------------------------------------------------------
# Single-pass kernel: one VMEM-resident column stripe per grid step.
# Stats + normalize are chunked over rows so no full-stripe f32 temps materialize.
# --------------------------------------------------------------------------------------
def _bn_stripe_kernel(x_ref, g_ref, b_ref, o_ref, *, n_total, pack, group, eps,
                      row_chunk):
    rows, te = x_ref.shape
    n_chunks = rows // row_chunk
    rem = rows - n_chunks * row_chunk
    inv_n = 1.0 / n_total

    def _load(start, size):
        return x_ref[pl.ds(start, size), :].astype(jnp.float32)

    # ---- pass 1: per-lane row sum -> per-feature mean ---------------------------------
    def _sum_body(c, acc):
        start = pl.multiple_of(c * row_chunk, row_chunk)
        return acc + jnp.sum(_load(start, row_chunk), axis=0, keepdims=True)

    s = jnp.zeros((1, te), jnp.float32)
    if n_chunks > 0:
        s = jax.lax.fori_loop(0, n_chunks, _sum_body, s)
    if rem > 0:
        s = s + jnp.sum(_load(n_chunks * row_chunk, rem), axis=0, keepdims=True)
    mean = _combine_lane_groups(s, pack, group) * inv_n

    # ---- pass 2: centered sum of squares -> biased variance (robust) ------------------
    def _ss_body(c, acc):
        start = pl.multiple_of(c * row_chunk, row_chunk)
        d = _load(start, row_chunk) - mean
        return acc + jnp.sum(d * d, axis=0, keepdims=True)

    ss = jnp.zeros((1, te), jnp.float32)
    if n_chunks > 0:
        ss = jax.lax.fori_loop(0, n_chunks, _ss_body, ss)
    if rem > 0:
        d = _load(n_chunks * row_chunk, rem) - mean
        ss = ss + jnp.sum(d * d, axis=0, keepdims=True)
    var = _combine_lane_groups(ss, pack, group) * inv_n

    inv_std = jax.lax.rsqrt(var + eps)
    scale = g_ref[...].astype(jnp.float32) * inv_std
    shift = b_ref[...].astype(jnp.float32) - mean * scale

    # ---- pass 3: fused normalize (2 VPU ops/elem) + store ------------------------------
    def _store(start, size):
        xc = x_ref[pl.ds(start, size), :].astype(jnp.float32)
        o_ref[pl.ds(start, size), :] = (xc * scale + shift).astype(o_ref.dtype)

    def _store_body(c, carry):
        _store(pl.multiple_of(c * row_chunk, row_chunk), row_chunk)
        return carry

    if n_chunks > 0:
        jax.lax.fori_loop(0, n_chunks, _store_body, 0)
    if rem > 0:
        _store(n_chunks * row_chunk, rem)


# --------------------------------------------------------------------------------------
# Two-pass fallback: stats pass (shifted sums, row tiles, optional 2-way core split),
# then an apply pass with a fused per-feature scale/shift.
# --------------------------------------------------------------------------------------
def _bn_stats_kernel(x_ref, shift_ref, sum_ref, sumsq_ref, *,
                     tiles_per_split, valid_rows_last, needs_mask):
    i = pl.program_id(2)  # row-tile index within split (reduction axis, last)

    @pl.when(i == 0)
    def _init():
        sum_ref[...] = jnp.zeros_like(sum_ref)
        sumsq_ref[...] = jnp.zeros_like(sumsq_ref)

    xc = x_ref[...].astype(jnp.float32) - shift_ref[...]

    def _accum(v):
        sum_ref[...] += jnp.sum(v, axis=0, keepdims=True)[None]
        sumsq_ref[...] += jnp.sum(v * v, axis=0, keepdims=True)[None]

    if needs_mask:
        # Masking is only emitted when the last global row tile is partial, and only
        # executed on that tile; all other tiles take the plain accumulate.
        r = pl.program_id(0)
        is_last = jnp.logical_and(r == pl.num_programs(0) - 1, i == tiles_per_split - 1)

        @pl.when(is_last)
        def _masked():
            rowid = jax.lax.broadcasted_iota(jnp.int32, xc.shape, 0)
            _accum(jnp.where(rowid < valid_rows_last, xc, 0.0))

        @pl.when(jnp.logical_not(is_last))
        def _plain():
            _accum(xc)
    else:
        _accum(xc)


def _bn_apply_kernel(x_ref, scale_ref, shift_ref, o_ref):
    x = x_ref[...].astype(jnp.float32)
    o_ref[...] = (x * scale_ref[...] + shift_ref[...]).astype(o_ref.dtype)


# --------------------------------------------------------------------------------------
# Wrapper
# --------------------------------------------------------------------------------------
def normalization_forward(x, gamma, beta, *, eps=EPS, donate_input=False,
                          force_two_pass=False, row_tile=None, lane_tile=None,
                          row_chunk=256):
    """BatchNorm1d-style normalization of x:(B, S, E) with affine gamma/beta:(E,).

    Training-mode batch statistics (biased variance), matching the module's forward.
    Set donate_input=True only if the caller actually donates x (otherwise no aliasing
    is requested, avoiding a defensive XLA copy).
    # TODO(synk): running-stat (eval-mode) tracking and the 'instance' normalization
    # branch of the module are not implemented.
    """
    B, S, E = x.shape
    N = B * S
    itemsize = jnp.dtype(x.dtype).itemsize
    row_chunk = max(8, (int(row_chunk) // 8) * 8)

    # ---- lane packing: make the lane (last) dim dense for small E ----------------------
    pack = 1
    if E < 128 and 128 % E == 0 and N % (128 // E) == 0:
        pack = 128 // E
    # TODO(synk): E < 128 that does not divide 128 stays lane-sparse (masked stores).
    np_rows = N // pack
    ep = E * pack
    xp = x.reshape(np_rows, ep)                       # lane l <-> feature (l % E)
    g_lanes = jnp.tile(gamma.astype(jnp.float32), pack).reshape(1, ep)
    b_lanes = jnp.tile(beta.astype(jnp.float32), pack).reshape(1, ep)

    # ---- VMEM-aware sizing (v5e/v6e: 128 MiB, v7x: 64 MiB per TensorCore) --------------
    vmem_cap = _vmem_capacity_bytes()
    vmem_limit = int(min(vmem_cap - (4 << 20), (vmem_cap * 7) // 8))
    tile_budget = (vmem_limit * 4) // 5
    alias_kwargs = {"input_output_aliases": {0: 0}} if donate_input else {}

    def _cparams(sem):
        return pltpu.CompilerParams(dimension_semantics=sem,
                                    vmem_limit_bytes=vmem_limit)

    lane_cands = _lane_tile_candidates(ep)
    if lane_tile is not None and pack == 1:
        lane_cands = [int(lane_tile)]

    total_bytes = np_rows * ep * itemsize
    small = total_bytes <= _SMALL_SINGLE_STRIPE_BYTES

    # ---- single-pass path selection -----------------------------------------------------
    te_single = None
    if not force_two_pass:
        fitting = [t for t in lane_cands
                   if _stripe_vmem_bytes(np_rows, t, itemsize, row_chunk) <= tile_budget]
        if fitting:
            if small:
                te_single = max(fitting)          # 1-2 stripes is fine for tiny arrays
            else:
                good = [t for t in fitting if ep // t >= 3]   # pipeline + megacore
                if good:
                    capped = [t for t in good if t <= 1024]   # wide DMA rows, bounded VMEM
                    te_single = max(capped) if capped else min(good)

    if te_single is not None:
        te = te_single
        n_stripes = -(-ep // te)
        out = pl.pallas_call(
            functools.partial(_bn_stripe_kernel, n_total=N, pack=pack, group=E, eps=eps,
                              row_chunk=row_chunk),
            out_shape=jax.ShapeDtypeStruct((np_rows, ep), x.dtype),
            grid=(n_stripes,),
            in_specs=[
                pl.BlockSpec((np_rows, te), lambda j: (0, j)),
                pl.BlockSpec((1, te), lambda j: (0, j)),
                pl.BlockSpec((1, te), lambda j: (0, j)),
            ],
            out_specs=pl.BlockSpec((np_rows, te), lambda j: (0, j)),
            compiler_params=_cparams(("parallel",)),
            **alias_kwargs,
        )(xp, g_lanes, b_lanes)
        return out.reshape(B, S, E)

    # ---- two-pass fallback ---------------------------------------------------------------
    te_caps = [t for t in lane_cands if t <= 1024]
    te = max(te_caps) if te_caps else min(lane_cands)
    n_stripes = -(-ep // te)

    per_elem = 4 * itemsize + 16
    if row_tile is None:
        tn = tile_budget // (per_elem * te)
        tn = max(8, min(1024, (tn // 8) * 8))
    else:
        tn = max(8, (int(row_tile) // 8) * 8)
    tn = min(tn, max(8, (-(-np_rows // 8)) * 8))      # never larger than the row extent
    n_tiles = -(-np_rows // tn)

    # 2-way row split ("parallel") so both v7x TensorCores work even with 1 feature stripe.
    n_split = 2 if (n_tiles >= 2 and n_tiles % 2 == 0) else 1
    tiles_per_split = n_tiles // n_split
    needs_mask = (np_rows % tn) != 0
    valid_rows_last = np_rows - (n_tiles - 1) * tn

    # Shift = per-feature mean of the first few rows -> numerically robust shifted sums.
    rows0 = min(N, 64)
    shift_feat = x.reshape(N, E)[:rows0].astype(jnp.float32).mean(axis=0)
    shift_lanes = jnp.tile(shift_feat, pack).reshape(1, ep)

    ssum, ssq = pl.pallas_call(
        functools.partial(_bn_stats_kernel, tiles_per_split=tiles_per_split,
                          valid_rows_last=valid_rows_last, needs_mask=needs_mask),
        out_shape=(jax.ShapeDtypeStruct((n_split, 1, ep), jnp.float32),
                   jax.ShapeDtypeStruct((n_split, 1, ep), jnp.float32)),
        grid=(n_split, n_stripes, tiles_per_split),
        in_specs=[
            pl.BlockSpec((tn, te), lambda r, j, i: (r * tiles_per_split + i, j)),
            pl.BlockSpec((1, te), lambda r, j, i: (0, j)),
        ],
        out_specs=(pl.BlockSpec((1, 1, te), lambda r, j, i: (r, 0, j)),
                   pl.BlockSpec((1, 1, te), lambda r, j, i: (r, 0, j))),
        compiler_params=_cparams(("parallel", "parallel", "arbitrary")),
    )(xp, shift_lanes)

    # Tiny per-feature epilogue in plain JAX (negligible vs. the HBM-bound passes).
    s_feat = ssum.sum(axis=0).reshape(ep).reshape(pack, E).sum(axis=0)
    q_feat = ssq.sum(axis=0).reshape(ep).reshape(pack, E).sum(axis=0)
    mean_f = shift_feat + s_feat / N
    var_f = jnp.maximum(q_feat / N - (s_feat / N) ** 2, 0.0)   # shifted -> robust
    inv_std = jax.lax.rsqrt(var_f + eps)
    scale_f = gamma.astype(jnp.float32) * inv_std
    offs_f = beta.astype(jnp.float32) - mean_f * scale_f
    scale_lanes = jnp.tile(scale_f, pack).reshape(1, ep)
    offs_lanes = jnp.tile(offs_f, pack).reshape(1, ep)

    out = pl.pallas_call(
        _bn_apply_kernel,
        out_shape=jax.ShapeDtypeStruct((np_rows, ep), x.dtype),
        grid=(n_stripes, n_tiles),
        in_specs=[
            pl.BlockSpec((tn, te), lambda j, i: (i, j)),
            pl.BlockSpec((1, te), lambda j, i: (0, j)),
            pl.BlockSpec((1, te), lambda j, i: (0, j)),
        ],
        out_specs=pl.BlockSpec((tn, te), lambda j, i: (i, j)),
        compiler_params=_cparams(("parallel", "parallel")),
        **alias_kwargs,
    )(xp, scale_lanes, offs_lanes)
    return out.reshape(B, S, E)


# --------------------------------------------------------------------------------------
# Reference + demo
# --------------------------------------------------------------------------------------
def _reference(x, gamma, beta, eps=EPS):
    E = x.shape[-1]
    xf = x.reshape(-1, E).astype(jnp.float32)
    mean = xf.mean(axis=0, keepdims=True)
    var = ((xf - mean) ** 2).mean(axis=0, keepdims=True)
    y = (xf - mean) / jnp.sqrt(var + eps) * gamma.astype(jnp.float32) \
        + beta.astype(jnp.float32)
    return y.reshape(x.shape).astype(x.dtype)


if __name__ == "__main__":
    key = jax.random.PRNGKey(0)

    # Primary shapes consistent with the module: (batch=2, seq=8, embed_dim=32).
    B, S, E = 2, 8, 32
    kx, kg, kb, k2, k3, k4 = jax.random.split(key, 6)
    x = jax.random.normal(kx, (B, S, E), dtype=jnp.float32)
    std = 1.0 / math.sqrt(E)  # mimics init_parameters: uniform(-1/sqrt(E), 1/sqrt(E))
    gamma = jax.random.uniform(kg, (E,), minval=-std, maxval=std, dtype=jnp.float32)
    beta = jax.random.uniform(kb, (E,), minval=-std, maxval=std, dtype=jnp.float32)

    # 1) Lane-packed (E=32 -> 128 lanes) single-pass path.
    y = jax.block_until_ready(normalization_forward(x, gamma, beta))
    assert jnp.allclose(y, _reference(x, gamma, beta), atol=1e-4, rtol=1e-4), \
        "mismatch vs reference (packed single-pass path)"

    # 2) Column-stripe single-pass path with in-kernel row-chunk loops (2 stripes).
    E2 = 256
    x2 = jax.random.normal(k2, (2, 80, E2), dtype=jnp.float32)
    g2 = jnp.linspace(0.5, 1.5, E2, dtype=jnp.float32)
    b2 = jnp.linspace(-0.25, 0.25, E2, dtype=jnp.float32)
    y2 = jax.block_until_ready(
        normalization_forward(x2, g2, b2, lane_tile=128, row_chunk=64))
    assert jnp.allclose(y2, _reference(x2, g2, b2), atol=1e-4, rtol=1e-4), \
        "mismatch vs reference (column-stripe path)"

    # 3) Two-pass fallback with a partial (masked) last row tile.
    E3 = 128
    x3 = jax.random.normal(k3, (2, 20, E3), dtype=jnp.float32) * 2.0 + 3.0
    g3 = jnp.linspace(0.9, 1.1, E3, dtype=jnp.float32)
    b3 = jnp.linspace(-0.1, 0.1, E3, dtype=jnp.float32)
    y3 = jax.block_until_ready(
        normalization_forward(x3, g3, b3, force_two_pass=True, row_tile=16))
    assert jnp.allclose(y3, _reference(x3, g3, b3), atol=1e-4, rtol=1e-4), \
        "mismatch vs reference (two-pass, masked last tile)"

    # 4) Two-pass fallback with lane packing and the 2-way core-split stats grid.
    x4 = jax.random.normal(k4, (2, 128, E), dtype=jnp.float32)
    y4 = jax.block_until_ready(
        normalization_forward(x4, gamma, beta, force_two_pass=True, row_tile=8))
    assert jnp.allclose(y4, _reference(x4, gamma, beta), atol=1e-4, rtol=1e-4), \
        "mismatch vs reference (two-pass, core-split + packed epilogue)"

    print("KERNEL_OK")
</pallas_src>

<mosaic_0001>
module attributes {stable_mosaic.version = 11 : i64} {
  func.func @_bn_stripe_kernel(%arg0: i32, %arg1: memref<4x128xf32, #tpu.memory_space<vmem>>, %arg2: memref<1x128xf32, #tpu.memory_space<vmem>>, %arg3: memref<1x128xf32, #tpu.memory_space<vmem>>, %arg4: memref<4x128xf32, #tpu.memory_space<vmem>>) attributes {dimension_semantics = [#tpu.dimension_semantics<parallel>], iteration_bounds = array<i64: 1>, scalar_prefetch = 0 : i64, scratch_operands = 0 : i64, tpu.core_type = #tpu.core_type<tc>, window_params = [{transform_indices = @transform_0, window_bounds = array<i64: 4, 128>}, {transform_indices = @transform_1, window_bounds = array<i64: 1, 128>}, {transform_indices = @transform_2, window_bounds = array<i64: 1, 128>}, {transform_indices = @transform_3, window_bounds = array<i64: 4, 128>}]} {
    %cst = arith.constant 0.000000e+00 : f32
    %0 = vector.broadcast %cst : f32 to vector<1x128xf32>
    %c0 = arith.constant 0 : index
    %c0_0 = arith.constant 0 : index
    %1 = vector.load %arg1[%c0, %c0_0] : memref<4x128xf32, #tpu.memory_space<vmem>>, vector<4x128xf32>
    %cst_1 = arith.constant dense<0.000000e+00> : vector<128xf32>
    %2 = vector.multi_reduction <add>, %1, %cst_1 [0] : vector<4x128xf32> to vector<128xf32>
    %3 = vector.shape_cast %2 : vector<128xf32> to vector<1x128xf32>
    %4 = arith.addf %0, %3 : vector<1x128xf32>
    %c32_i32 = arith.constant 32 : i32
    %5 = tpu.dynamic_rotate %4 by %c32_i32 dim 1 : vector<1x128xf32>, i32 -> vector<1x128xf32>
    %6 = arith.addf %4, %5 : vector<1x128xf32>
    %c64_i32 = arith.constant 64 : i32
    %7 = tpu.dynamic_rotate %4 by %c64_i32 dim 1 : vector<1x128xf32>, i32 -> vector<1x128xf32>
    %8 = arith.addf %6, %7 : vector<1x128xf32>
    %c96_i32 = arith.constant 96 : i32
    %9 = tpu.dynamic_rotate %4 by %c96_i32 dim 1 : vector<1x128xf32>, i32 -> vector<1x128xf32>
    %10 = arith.addf %8, %9 : vector<1x128xf32>
    %cst_2 = arith.constant 6.250000e-02 : f32
    %11 = vector.broadcast %cst_2 : f32 to vector<1x128xf32>
    %12 = arith.mulf %10, %11 : vector<1x128xf32>
    %cst_3 = arith.constant 0.000000e+00 : f32
    %13 = vector.broadcast %cst_3 : f32 to vector<1x128xf32>
    %c0_4 = arith.constant 0 : index
    %c0_5 = arith.constant 0 : index
    %14 = vector.load %arg1[%c0_4, %c0_5] : memref<4x128xf32, #tpu.memory_space<vmem>>, vector<4x128xf32>
    %15 = vector.broadcast %12 : vector<1x128xf32> to vector<4x128xf32>
    %16 = arith.subf %14, %15 : vector<4x128xf32>
    %17 = arith.mulf %16, %16 : vector<4x128xf32>
    %cst_6 = arith.constant dense<0.000000e+00> : vector<128xf32>
    %18 = vector.multi_reduction <add>, %17, %cst_6 [0] : vector<4x128xf32> to vector<128xf32>
    %19 = vector.shape_cast %18 : vector<128xf32> to vector<1x128xf32>
    %20 = arith.addf %13, %19 : vector<1x128xf32>
    %c32_i32_7 = arith.constant 32 : i32
    %21 = tpu.dynamic_rotate %20 by %c32_i32_7 dim 1 : vector<1x128xf32>, i32 -> vector<1x128xf32>
    %22 = arith.addf %20, %21 : vector<1x128xf32>
    %c64_i32_8 = arith.constant 64 : i32
    %23 = tpu.dynamic_rotate %20 by %c64_i32_8 dim 1 : vector<1x128xf32>, i32 -> vector<1x128xf32>
    %24 = arith.addf %22, %23 : vector<1x128xf32>
    %c96_i32_9 = arith.constant 96 : i32
    %25 = tpu.dynamic_rotate %20 by %c96_i32_9 dim 1 : vector<1x128xf32>, i32 -> vector<1x128xf32>
    %26 = arith.addf %24, %25 : vector<1x128xf32>
    %cst_10 = arith.constant 6.250000e-02 : f32
    %27 = vector.broadcast %cst_10 : f32 to vector<1x128xf32>
    %28 = arith.mulf %26, %27 : vector<1x128xf32>
    %cst_11 = arith.constant 9.99999974E-6 : f32
    %29 = vector.broadcast %cst_11 : f32 to vector<1x128xf32>
    %30 = arith.addf %28, %29 : vector<1x128xf32>
    %31 = math.rsqrt %30 : vector<1x128xf32>
    %c0_12 = arith.constant 0 : index
    %c0_13 = arith.constant 0 : index
    %32 = vector.load %arg2[%c0_12, %c0_13] : memref<1x128xf32, #tpu.memory_space<vmem>>, vector<1x128xf32>
    %33 = arith.mulf %32, %31 : vector<1x128xf32>
    %c0_14 = arith.constant 0 : index
    %c0_15 = arith.constant 0 : index
    %34 = vector.load %arg3[%c0_14, %c0_15] : memref<1x128xf32, #tpu.memory_space<vmem>>, vector<1x128xf32>
    %35 = arith.mulf %12, %33 : vector<1x128xf32>
    %36 = arith.subf %34, %35 : vector<1x128xf32>
    %c0_16 = arith.constant 0 : index
    %c0_17 = arith.constant 0 : index
    %37 = vector.load %arg1[%c0_16, %c0_17] : memref<4x128xf32, #tpu.memory_space<vmem>>, vector<4x128xf32>
    %38 = vector.broadcast %33 : vector<1x128xf32> to vector<4x128xf32>
    %39 = arith.mulf %37, %38 : vector<4x128xf32>
    %40 = vector.broadcast %36 : vector<1x128xf32> to vector<4x128xf32>
    %41 = arith.addf %39, %40 : vector<4x128xf32>
    %c0_18 = arith.constant 0 : index
    %c0_19 = arith.constant 0 : index
    %42 = vector.load %arg4[%c0_18, %c0_19] : memref<4x128xf32, #tpu.memory_space<vmem>>, vector<4x128xf32>
    tpu.vector_store %arg4[%c0_18, %c0_19], %41 {strides = array<i32>} : memref<4x128xf32, #tpu.memory_space<vmem>>, vector<4x128xf32>,
    return
  }
  func.func @transform_0(%arg0: i32) -> (i32, i32) {
    %c0_i32 = arith.constant 0 : i32
    %c0_i32_0 = arith.constant 0 : i32
    return %c0_i32, %arg0 : i32, i32
  }
  func.func @transform_1(%arg0: i32) -> (i32, i32) {
    %c0_i32 = arith.constant 0 : i32
    %c0_i32_0 = arith.constant 0 : i32
    return %c0_i32, %arg0 : i32, i32
  }
  func.func @transform_2(%arg0: i32) -> (i32, i32) {
    %c0_i32 = arith.constant 0 : i32
    %c0_i32_0 = arith.constant 0 : i32
    return %c0_i32, %arg0 : i32, i32
  }
  func.func @transform_3(%arg0: i32) -> (i32, i32) {
    %c0_i32 = arith.constant 0 : i32
    %c0_i32_0 = arith.constant 0 : i32
    return %c0_i32, %arg0 : i32, i32
  }
}

</mosaic_0001>

<bundles_post_ra>
// kernel: tpu_custom_call.1
= control target key start
LH: loop header
LB: loop body
LE: loop exit
PB: predicated region body
PF: predicated region fallthrough
CT: control target
= control target key end

     0   :  { %8 = vsyncpa [#allocation3], 0  ;;  %s220_s0 = inlined_call_operand.hbm [shape: f32[4,128], index: 0, kind: input, shape index: {}]   ;;  %s221_s1 = inlined_call_operand.vmem [shape: f32[1,128], index: 1, kind: input, shape index: {}]   ;;  %s222_s2 = inlined_call_operand.vmem [shape: f32[1,128], index: 2, kind: input, shape index: {}]   ;;  %s223_s3 = inlined_call_operand.hbm [shape: f32[4,128], index: 3, kind: output, shape index: {}]  }
   0x1   :  { %9 = vsyncpa [#allocation4], 0  ;;  %s163_s12 = smov [#allocation2]   ;;  %s115_s16 = scalar_lea.hbm %s220_s0, 64 }
   0x2   :  { %s16_s13 = sshll.u32 %s163_s12, 4  ;;  %p116_p0 = scmp.ne.s32.totalorder %s220_s0, %s115_s16  ;;  %s17_s13 = int_to_ptr.vmem [resolvable:$true] %s16_s13 }
   0x3   :  { %p119_p1 = scmp.lt.u32.totalorder %s115_s16, %s220_s0 }
   0x5   :  { %p121_p2 = pnand %p119_p1, %p116_p0 }
   0x7   :  { %124 = shalt.err (!%p121_p2)
}
   0x8   :  { %s125_s21 = scalar_lea.vmem %s17_s13, 64  ;;  %p130_p4 = scmp.lt.s32.totalorder %s17_s13, %s17_s13 }
   0x9   :  { %p126_p3 = scmp.ne.s32.totalorder %s17_s13, %s125_s21  ;;  %p131_p5 = scmp.lt.s32.totalorder %s125_s21, %s125_s21 }
   0xb   :  { %p132_p6 = por %p131_p5, %p130_p4 }
   0xd   :  { %p133_p7 = pnand %p132_p6, %p126_p3 }
   0xf   :  { %136 = shalt.err (!%p133_p7)
}
  0x10   :  { %19 = dma.hbm_to_vmem [thread:$0]  %s220_s0, 64, %s17_s13, [#allocation3]  }
  0x11   :  { %159 = dma.done.wait [#allocation3], 64  }
  0x12   :  { %160 = vsyncadd [#allocation3], 4294967232  ;;  %vm28_vm0 = vcmask 1043456   ;;  %v27_v0 = vld [vmem:[#allocation2] sm:$0xf]  ;;  %s164_s24 = smov 32   ;;  %v47_v8 = vlaneseq }
  0x13   :  { %v29_v1 = vsel %vm28_vm0, %v27_v0, 0.0  ;;  %s165_s25 = smov 96   ;;  %s166_s26 = smov 64   ;;  %v73_v36 = vld [vmem:[%s221_s1] sm:$0x1] }
  0x14   :  { %v30_v2 = vrot.slane %v29_v1, 4  ;;  %v48_v11 = vshrl.u32 %v47_v8, 7  ;;  %v75_v39 = vld [vmem:[%s222_s2] sm:$0x1]  ;;  %s167_s30 = smov [#allocation5]  }
  0x15   :  { %s99_s4 = sshll.u32 %s167_s30, 4  ;;  %s100_s4 = int_to_ptr.vmem [resolvable:$true] %s99_s4 }
  0x16   :  { %v31_v3 = vadd.f32 %v30_v2, %v29_v1  ;;  %v49_v15 = vsub.s32 0, %v48_v11  ;;  %s137_s5 = scalar_lea.vmem %s100_s4, 64  ;;  %p142_p9 = scmp.lt.s32.totalorder %s100_s4, %s100_s4 }
  0x17   :  { %p138_p8 = scmp.ne.s32.totalorder %s100_s4, %s137_s5  ;;  %p143_p10 = scmp.lt.s32.totalorder %s137_s5, %s137_s5 }
  0x18   :  { %v32_v4 = vrot.slane %v31_v3, 2 }
  0x19   :  { %p144_p11 = por %p143_p10, %p142_p9 }
  0x1a   :  { %v33_v5 = vadd.f32 %v32_v4, %v31_v3 }
  0x1b   :  { %p145_p12 = pnand %p144_p11, %p138_p8 }
  0x1c   :  { %v34_v6 = vrot.slane %v33_v5, 1 }
  0x1e   :  { %v35_v7 = vadd.f32 %v34_v6, %v33_v5 }
  0x20   :  { %37 = vrot.lane.b32.xlu0 %v35_v7, %s164_s24  ;;  %43 = vrot.lane.b32.xlu1 %v35_v7, %s165_s25 }
  0x24   :  { %40 = vrot.lane.b32.xlu0 %v35_v7, %s166_s26 }
  0x92   :  { %v38_v9 = vpop.permute.xlu0 %37  ;;  %v44_v13 = vpop.permute.xlu1 %43 }
  0x93   :  { %v39_v10 = vadd.f32 %v38_v9, %v35_v7 }
  0x96   :  { %v41_v12 = vpop.permute.xlu0 %40 }
  0x97   :  { %v42_v14 = vadd.f32 %v41_v12, %v39_v10 }
  0x99   :  { %v45_v16 = vadd.f32 %v44_v13, %v42_v14 }
  0x9b   :  { %v46_v17 = vmul.f32 0.0625, %v45_v16 }
  0x9d   :  { %v50_v18 = vrot.slane %v46_v17, %v49_v15 }
  0x9f   :  { %v51_v19 = vsub.f32 %v27_v0, %v50_v18 }
  0xa1   :  { %v52_v20 = vmul.f32 %v51_v19, %v51_v19 }
  0xa3   :  { %v53_v21 = vsel %vm28_vm0, %v52_v20, 0.0 }
  0xa4   :  { %v54_v22 = vrot.slane %v53_v21, 4 }
  0xa6   :  { %v55_v23 = vadd.f32 %v54_v22, %v53_v21 }
  0xa8   :  { %v56_v24 = vrot.slane %v55_v23, 2 }
  0xaa   :  { %v57_v25 = vadd.f32 %v56_v24, %v55_v23 }
  0xac   :  { %v58_v26 = vrot.slane %v57_v25, 1 }
  0xae   :  { %v59_v27 = vadd.f32 %v58_v26, %v57_v25 }
  0xb0   :  { %64 = vrot.lane.b32.xlu0 %v59_v27, %s166_s26  ;;  %61 = vrot.lane.b32.xlu1 %v59_v27, %s164_s24 }
  0xb4   :  { %67 = vrot.lane.b32.xlu1 %v59_v27, %s165_s25 }
 0x122   :  { %v62_v28 = vpop.permute.xlu1 %61  ;;  %v65_v30 = vpop.permute.xlu0 %64 }
 0x123   :  { %v63_v29 = vadd.f32 %v62_v28, %v59_v27 }
 0x125   :  { %v66_v31 = vadd.f32 %v65_v30, %v63_v29 }
 0x126   :  { %v68_v32 = vpop.permute.xlu1 %67 }
 0x127   :  { %v69_v33 = vadd.f32 %v68_v32, %v66_v31 }
 0x129   :  { %v70_v34 = vmul.f32 0.0625, %v69_v33 }
 0x12b   :  { %v71_v35 = vadd.f32 1e-05, %v70_v34 }
 0x12d   :  { %113 = vrsqrt.f32 %v71_v35 }
 0x137   :  { %v114_v37 = vpop.eup %113 }
 0x138   :  { %v74_v38 = vmul.f32 %v114_v37, %v73_v36 }
 0x13a   :  { %v76_v40 = vmul.f32 %v74_v38, %v46_v17  ;;  %v82_v41 = vrot.slane %v74_v38, %v49_v15 }
 0x13c   :  { %v77_v42 = vsub.f32 %v75_v39, %v76_v40  ;;  %v84_v43 = vmul.f32 %v82_v41, %v27_v0 }
 0x13e   :  { %v89_v44 = vrot.slane %v77_v42, %v49_v15 }
 0x140   :  { %v91_v45 = vadd.f32 %v89_v44, %v84_v43 }
 0x142   :  { %92 = vst [vmem:[#allocation5] sm:$0xf] %v91_v45 }
 0x143   :  { %148 = shalt.err (!%p145_p12)
}
 0x144   :  { %s149_s2 = scalar_lea.hbm %s223_s3, 64 }
 0x145   :  { %p150_p13 = scmp.ne.s32.totalorder %s223_s3, %s149_s2  ;;  %p153_p0 = scmp.lt.u32.totalorder %s149_s2, %s223_s3 }
 0x147   :  { %p155_p1 = pnand %p153_p0, %p150_p13 }
 0x149   :  { %158 = shalt.err (!%p155_p1)
}
 0x14a   :  { %102 = dma.vmem_to_hbm [thread:$0]  %s100_s4, 64, %s223_s3, [#allocation4]  }
 0x14b   :  { %161 = dma.done.wait [#allocation4], 64  }
 0x14c   :  { %162 = vsyncadd [#allocation4], 4294967232 }
 0x14d   :  { %106 = vsyncpa [#allocation3], 1 }
 0x14e   :  { %107 = vsyncpa [#allocation4], 1 }

</bundles_post_ra>
